<compile_context>
chip_gen: v5e
topology: v5e:2x2
jax: 0.10.0
libtpu: 0.0.40
codegen_flags: <defaults>
</compile_context>

<pallas_src>
import functools

import jax
import jax.numpy as jnp
from jax.experimental import pallas as pl
from jax.experimental.pallas import tpu as pltpu

_NEG_BIG = -1.0e30       # finite "-inf" sentinel: avoids inf-inf NaNs in the online combine
_BYTES_PER_ELEM = 64     # 2 logit streams x 2 pipeline buffers x 4B + ~12 live f32 (TB,TC) temps
_ROW_OVERHEAD = 12 * 1024  # (TB,1) accumulators / row temporaries, lane-padded to 128
_MAX_TILE_B = 2048


def _distill_kernel(s_ref, t_ref, tgt_ref, out_ref,
                    smax_sc, ssum_sc, sssum_sc, ttmax_sc, ttsum_sc,
                    cross_sc, picked_sc,
                    *, inv_t, n_valid, tile_b, tile_c, needs_row_mask):
    i = pl.program_id(0)            # batch-tile index ("parallel")
    j = pl.program_id(1)            # class-tile index ("arbitrary", innermost)
    nc = pl.num_programs(1)

    # ---- reset the per-row running state at the start of every batch tile ----
    @pl.when(j == 0)
    def _():
        neg = jnp.full(smax_sc.shape, _NEG_BIG, jnp.float32)
        zero = jnp.zeros(ssum_sc.shape, jnp.float32)
        smax_sc[...] = neg
        ttmax_sc[...] = neg
        ssum_sc[...] = zero
        sssum_sc[...] = zero
        ttsum_sc[...] = zero
        cross_sc[...] = zero
        picked_sc[...] = zero

    s = s_ref[...].astype(jnp.float32)        # (TB, TC) student logits block
    t = t_ref[...].astype(jnp.float32)        # (TB, TC) teacher logits block
    tgt = tgt_ref[...]                        # (TB, 1) int32 class indices
    TB, TC = s.shape
    invT = jnp.float32(inv_t)

    # previous running state
    smax_o = smax_sc[...]
    ttmax_o = ttmax_sc[...]
    ssum_o = ssum_sc[...]
    sssum_o = sssum_sc[...]
    ttsum_o = ttsum_sc[...]
    cross_o = cross_sc[...]
    picked_o = picked_sc[...]

    # ---- block-local shifted exponentials (online-softmax style) ----
    tt = t * invT
    bs_max = jnp.max(s, axis=1, keepdims=True)
    btt_max = jnp.max(tt, axis=1, keepdims=True)

    smax_n = jnp.maximum(smax_o, bs_max)
    ttmax_n = jnp.maximum(ttmax_o, btt_max)
    ssmax_o = smax_o * invT
    ssmax_n = smax_n * invT

    a_s = jnp.exp(smax_o - smax_n)
    a_ss = jnp.exp(ssmax_o - ssmax_n)
    a_t = jnp.exp(ttmax_o - ttmax_n)

    s_sh = s - smax_n
    ss_sh = s_sh * invT            # == s/T - ssmax_n  (shared shift reused)
    tt_sh = tt - ttmax_n
    s_exp = jnp.exp(s_sh)
    ss_exp = jnp.exp(ss_sh)
    tt_exp = jnp.exp(tt_sh)

    b_ssum = jnp.sum(s_exp, axis=1, keepdims=True)
    b_sssum = jnp.sum(ss_exp, axis=1, keepdims=True)
    b_ttsum = jnp.sum(tt_exp, axis=1, keepdims=True)
    b_cross = jnp.sum(tt_exp * (tt_sh - ss_sh), axis=1, keepdims=True)

    # hard-loss pick: one-hot via iota compare (no gather); raw logit, exact.
    col = jax.lax.broadcasted_iota(jnp.int32, (TB, TC), 1) + j * tile_c
    onehot = (col == tgt).astype(jnp.float32)
    b_picked = jnp.sum(onehot * s, axis=1, keepdims=True)

    # ---- online combine with the running state ----
    delta = (ttmax_o - ttmax_n) + (ssmax_n - ssmax_o)
    ssum_n = a_s * ssum_o + b_ssum
    sssum_n = a_ss * sssum_o + b_sssum
    cross_n = a_t * (cross_o + ttsum_o * delta) + b_cross
    ttsum_n = a_t * ttsum_o + b_ttsum
    picked_n = picked_o + b_picked

    smax_sc[...] = smax_n
    ttmax_sc[...] = ttmax_n
    ssum_sc[...] = ssum_n
    sssum_sc[...] = sssum_n
    ttsum_sc[...] = ttsum_n
    cross_sc[...] = cross_n
    picked_sc[...] = picked_n

    # ---- finalize: single fused lane-dense partial output per batch tile ----
    @pl.when(j == nc - 1)
    def _():
        hard_rows = smax_n + jnp.log(ssum_n) - picked_n                     # (TB, 1)
        soft_rows = (cross_n * pl.reciprocal(ttsum_n, approx=True)
                     + jnp.log(sssum_n) - jnp.log(ttsum_n))                 # (TB, 1)
        if needs_row_mask:   # static: only present when the batch was padded
            row = jax.lax.broadcasted_iota(jnp.int32, (TB, 1), 0) + i * tile_b
            valid = (row < n_valid).astype(jnp.float32)
            hard_rows = hard_rows * valid
            soft_rows = soft_rows * valid
        hard_part = jnp.sum(hard_rows)
        soft_part = jnp.sum(soft_rows)
        sub = jax.lax.broadcasted_iota(jnp.int32, out_ref.shape, 1)
        out_ref[...] = jnp.where(sub == 0, hard_part,
                                 jnp.where(sub == 1, soft_part, 0.0))


def _round_up(x, m):
    return ((x + m - 1) // m) * m


def _vmem_policy():
    """Chip-aware (vmem_limit_bytes, tile-sizing budget)."""
    try:
        cap = int(pltpu.get_tpu_info().vmem_capacity_bytes)
    except Exception:  # pragma: no cover - conservative fallback (v7x-sized VMEM)
        cap = 64 * 1024 * 1024
    limit = min(cap // 2, 96 * 1024 * 1024)       # 64 MiB on v5e/v6e, 32 MiB on v7x
    limit = max(limit, 32 * 1024 * 1024)
    budget = (limit * 5) // 8                     # working-set target for tile sizing
    return limit, budget


def _pick_tiles(B, C, budget):
    b_ceil = _round_up(max(B, 1), 8)
    # Keep >= 2 batch tiles when the batch is big enough so the "parallel" axis
    # actually shards across both v7x TensorCores; harmless on v5e/v6e.
    two_core_cap = _round_up((B + 1) // 2, 8) if B >= 16 else b_ceil

    def rows_that_fit(tc):
        per_row = _BYTES_PER_ELEM * tc + _ROW_OVERHEAD
        return (budget // per_row // 8) * 8

    if rows_that_fit(C) >= 8:
        tile_c = C                                # whole class dim per block
        tile_b = rows_that_fit(C)
    else:
        # vocab-scale C: tile the class dim (multiple of 128), target ~256 rows
        tile_c = max(128, ((budget // 256 - _ROW_OVERHEAD)
                           // _BYTES_PER_ELEM // 128) * 128)
        tile_b = rows_that_fit(tile_c)
    tile_b = max(8, min(tile_b, _MAX_TILE_B, b_ceil, two_core_cap))
    return tile_b, tile_c


def distillation_loss(student_logits, teacher_logits, targets,
                      alpha=0.5, temperature=3.0, *, tile_b=None, tile_c=None):
    B, C = student_logits.shape
    tgt = jnp.reshape(targets, (B,)).astype(jnp.int32)

    vmem_limit, budget = _vmem_policy()
    auto_tb, auto_tc = _pick_tiles(B, C, budget)
    tile_b = auto_tb if tile_b is None else max(8, _round_up(int(tile_b), 8))
    tile_c = auto_tc if tile_c is None else int(tile_c)
    if tile_c != C:
        assert tile_c % 128 == 0, "class tile must be a multiple of 128 when < C"

    # Pad the batch to a multiple of tile_b (padded rows masked in-kernel).
    b_pad = _round_up(B, tile_b)
    if b_pad != B:
        student_logits = jnp.pad(student_logits, ((0, b_pad - B), (0, 0)))
        teacher_logits = jnp.pad(teacher_logits, ((0, b_pad - B), (0, 0)))
        tgt = jnp.pad(tgt, (0, b_pad - B))
    # Pad classes only on the C-tiled path; huge-negative logits contribute 0 to
    # every max / sum-exp and can never be the target column.
    c_pad = C if tile_c == C else _round_up(C, tile_c)
    if c_pad != C:
        student_logits = jnp.pad(student_logits, ((0, 0), (0, c_pad - C)),
                                 constant_values=_NEG_BIG)
        teacher_logits = jnp.pad(teacher_logits, ((0, 0), (0, c_pad - C)),
                                 constant_values=_NEG_BIG)
    tgt2 = tgt.reshape(b_pad, 1)

    num_b_tiles = b_pad // tile_b
    num_c_tiles = c_pad // tile_c

    kernel = functools.partial(
        _distill_kernel,
        inv_t=1.0 / float(temperature),
        n_valid=B,
        tile_b=tile_b,
        tile_c=tile_c,
        needs_row_mask=(b_pad != B),
    )

    partials = pl.pallas_call(
        kernel,
        out_shape=jax.ShapeDtypeStruct((num_b_tiles, 8, 128), jnp.float32),
        grid=(num_b_tiles, num_c_tiles),
        in_specs=[
            pl.BlockSpec((tile_b, tile_c), lambda i, j: (i, j)),
            pl.BlockSpec((tile_b, tile_c), lambda i, j: (i, j)),
            pl.BlockSpec((tile_b, 1), lambda i, j: (i, 0)),
        ],
        out_specs=pl.BlockSpec((1, 8, 128), lambda i, j: (i, 0, 0)),
        scratch_shapes=[pltpu.VMEM((tile_b, 1), jnp.float32)] * 7,
        compiler_params=pltpu.CompilerParams(
            dimension_semantics=("parallel", "arbitrary"),
            vmem_limit_bytes=vmem_limit,
        ),
    )(student_logits, teacher_logits, tgt2)

    inv_b = jnp.float32(1.0 / B)
    hard = jnp.sum(partials[:, 0, 0]) * inv_b
    soft = jnp.sum(partials[:, 1, 0]) * inv_b * jnp.float32(temperature) ** 2
    total = (1.0 - alpha) * hard + alpha * soft
    return total, hard, soft


def _reference(student_logits, teacher_logits, targets, alpha=0.5, T=3.0):
    tgt = targets.reshape(-1).astype(jnp.int32)
    logp = jax.nn.log_softmax(student_logits, axis=1)
    hard = -jnp.mean(jnp.take_along_axis(logp, tgt[:, None], axis=1))
    log_ps = jax.nn.log_softmax(student_logits / T, axis=1)
    log_q = jax.nn.log_softmax(teacher_logits / T, axis=1)
    q = jnp.exp(log_q)
    soft = jnp.sum(q * (log_q - log_ps)) / student_logits.shape[0] * T * T
    total = (1 - alpha) * hard + alpha * soft
    return total, hard, soft


def _check(got, ref, tol):
    g_tot, g_h, g_s = got
    r_tot, r_h, r_s = ref
    assert jnp.allclose(g_h, r_h, rtol=1e-4, atol=1e-4), (g_h, r_h)
    # soft/total use approx-reciprocal on the EUP -> slightly looser tolerance
    assert jnp.allclose(g_s, r_s, rtol=tol, atol=tol), (g_s, r_s)
    assert jnp.allclose(g_tot, r_tot, rtol=tol, atol=tol), (g_tot, r_tot)


if __name__ == "__main__":
    key = jax.random.PRNGKey(0)
    k1, k2, k3, k4, k5, k6, k7, k8, k9 = jax.random.split(key, 9)

    # ---- case 1: small aligned shape (matches the PyTorch module's use) ----
    B, C = 8, 32
    s1 = jax.random.normal(k1, (B, C), dtype=jnp.float32)
    t1 = jax.random.normal(k2, (B, C), dtype=jnp.float32)
    y1 = jax.random.randint(k3, (B, 1), 0, C).astype(jnp.float32)
    out1 = distillation_loss(s1, t1, y1, alpha=0.5, temperature=3.0)
    jax.block_until_ready(out1)
    _check(out1, _reference(s1, t1, y1, 0.5, 3.0), tol=5e-3)

    # ---- case 2: batch not a multiple of 8 (exercises the padding mask) ----
    B2, C2 = 6, 96
    s2 = jax.random.normal(k4, (B2, C2), dtype=jnp.float32)
    t2 = jax.random.normal(k5, (B2, C2), dtype=jnp.float32)
    y2 = jax.random.randint(k6, (B2, 1), 0, C2).astype(jnp.float32)
    out2 = distillation_loss(s2, t2, y2, alpha=0.3, temperature=2.0)
    jax.block_until_ready(out2)
    _check(out2, _reference(s2, t2, y2, 0.3, 2.0), tol=5e-3)

    # ---- case 3: forced C-tiling (online-softmax combine + class padding) ----
    B3, C3 = 20, 300
    s3 = jax.random.normal(k7, (B3, C3), dtype=jnp.float32)
    t3 = jax.random.normal(k8, (B3, C3), dtype=jnp.float32)
    y3 = jax.random.randint(k9, (B3, 1), 0, C3).astype(jnp.float32)
    out3 = distillation_loss(s3, t3, y3, alpha=0.7, temperature=4.0,
                             tile_b=8, tile_c=128)
    jax.block_until_ready(out3)
    _check(out3, _reference(s3, t3, y3, 0.7, 4.0), tol=5e-3)

    # ---- case 4: same data, auto tiles (>= 2 batch tiles for the 2-TC path) ----
    out4 = distillation_loss(s3, t3, y3, alpha=0.7, temperature=4.0)
    jax.block_until_ready(out4)
    _check(out4, _reference(s3, t3, y3, 0.7, 4.0), tol=5e-3)

    print("KERNEL_OK")
</pallas_src>

<mosaic_0001>
module attributes {stable_mosaic.version = 11 : i64} {
  func.func @_distill_kernel(%arg0: i32, %arg1: i32, %arg2: memref<8x32xf32, #tpu.memory_space<vmem>>, %arg3: memref<8x32xf32, #tpu.memory_space<vmem>>, %arg4: memref<8x1xi32, #tpu.memory_space<vmem>>, %arg5: memref<1x8x128xf32, #tpu.memory_space<vmem>>, %arg6: memref<8x1xf32, #tpu.memory_space<vmem>>, %arg7: memref<8x1xf32, #tpu.memory_space<vmem>>, %arg8: memref<8x1xf32, #tpu.memory_space<vmem>>, %arg9: memref<8x1xf32, #tpu.memory_space<vmem>>, %arg10: memref<8x1xf32, #tpu.memory_space<vmem>>, %arg11: memref<8x1xf32, #tpu.memory_space<vmem>>, %arg12: memref<8x1xf32, #tpu.memory_space<vmem>>) attributes {dimension_semantics = [#tpu.dimension_semantics<parallel>, #tpu.dimension_semantics<arbitrary>], iteration_bounds = array<i64: 1, 1>, scalar_prefetch = 0 : i64, scratch_operands = 7 : i64, tpu.core_type = #tpu.core_type<tc>, window_params = [{transform_indices = @transform_0, window_bounds = array<i64: 8, 32>}, {transform_indices = @transform_1, window_bounds = array<i64: 8, 32>}, {transform_indices = @transform_2, window_bounds = array<i64: 8, 1>}, {transform_indices = @transform_3, window_bounds = array<i64: 1, 8, 128>}]} {
    %c0_i32 = arith.constant 0 : i32
    %0 = arith.cmpi eq, %arg1, %c0_i32 : i32
    %1 = arith.extui %0 : i1 to i32
    %c0_i32_0 = arith.constant 0 : i32
    %2 = arith.cmpi ne, %1, %c0_i32_0 : i32
    scf.if %2 {
      %cst_46 = arith.constant -1.000000e+30 : f32
      %85 = vector.broadcast %cst_46 : f32 to vector<8x1xf32>
      %cst_47 = arith.constant 0.000000e+00 : f32
      %86 = vector.broadcast %cst_47 : f32 to vector<8x1xf32>
      %c0_48 = arith.constant 0 : index
      %c0_49 = arith.constant 0 : index
      %87 = vector.load %arg6[%c0_48, %c0_49] : memref<8x1xf32, #tpu.memory_space<vmem>>, vector<8x1xf32>
      tpu.vector_store %arg6[%c0_48, %c0_49], %85 {strides = array<i32>} : memref<8x1xf32, #tpu.memory_space<vmem>>, vector<8x1xf32>,
      %c0_50 = arith.constant 0 : index
      %c0_51 = arith.constant 0 : index
      %88 = vector.load %arg9[%c0_50, %c0_51] : memref<8x1xf32, #tpu.memory_space<vmem>>, vector<8x1xf32>
      tpu.vector_store %arg9[%c0_50, %c0_51], %85 {strides = array<i32>} : memref<8x1xf32, #tpu.memory_space<vmem>>, vector<8x1xf32>,
      %c0_52 = arith.constant 0 : index
      %c0_53 = arith.constant 0 : index
      %89 = vector.load %arg7[%c0_52, %c0_53] : memref<8x1xf32, #tpu.memory_space<vmem>>, vector<8x1xf32>
      tpu.vector_store %arg7[%c0_52, %c0_53], %86 {strides = array<i32>} : memref<8x1xf32, #tpu.memory_space<vmem>>, vector<8x1xf32>,
      %c0_54 = arith.constant 0 : index
      %c0_55 = arith.constant 0 : index
      %90 = vector.load %arg8[%c0_54, %c0_55] : memref<8x1xf32, #tpu.memory_space<vmem>>, vector<8x1xf32>
      tpu.vector_store %arg8[%c0_54, %c0_55], %86 {strides = array<i32>} : memref<8x1xf32, #tpu.memory_space<vmem>>, vector<8x1xf32>,
      %c0_56 = arith.constant 0 : index
      %c0_57 = arith.constant 0 : index
      %91 = vector.load %arg10[%c0_56, %c0_57] : memref<8x1xf32, #tpu.memory_space<vmem>>, vector<8x1xf32>
      tpu.vector_store %arg10[%c0_56, %c0_57], %86 {strides = array<i32>} : memref<8x1xf32, #tpu.memory_space<vmem>>, vector<8x1xf32>,
      %c0_58 = arith.constant 0 : index
      %c0_59 = arith.constant 0 : index
      %92 = vector.load %arg11[%c0_58, %c0_59] : memref<8x1xf32, #tpu.memory_space<vmem>>, vector<8x1xf32>
      tpu.vector_store %arg11[%c0_58, %c0_59], %86 {strides = array<i32>} : memref<8x1xf32, #tpu.memory_space<vmem>>, vector<8x1xf32>,
      %c0_60 = arith.constant 0 : index
      %c0_61 = arith.constant 0 : index
      %93 = vector.load %arg12[%c0_60, %c0_61] : memref<8x1xf32, #tpu.memory_space<vmem>>, vector<8x1xf32>
      tpu.vector_store %arg12[%c0_60, %c0_61], %86 {strides = array<i32>} : memref<8x1xf32, #tpu.memory_space<vmem>>, vector<8x1xf32>,
    } else {
    }
    %c0 = arith.constant 0 : index
    %c0_1 = arith.constant 0 : index
    %3 = vector.load %arg2[%c0, %c0_1] : memref<8x32xf32, #tpu.memory_space<vmem>>, vector<8x32xf32>
    %c0_2 = arith.constant 0 : index
    %c0_3 = arith.constant 0 : index
    %4 = vector.load %arg3[%c0_2, %c0_3] : memref<8x32xf32, #tpu.memory_space<vmem>>, vector<8x32xf32>
    %c0_4 = arith.constant 0 : index
    %c0_5 = arith.constant 0 : index
    %5 = vector.load %arg4[%c0_4, %c0_5] : memref<8x1xi32, #tpu.memory_space<vmem>>, vector<8x1xi32>
    %c0_6 = arith.constant 0 : index
    %c0_7 = arith.constant 0 : index
    %6 = vector.load %arg6[%c0_6, %c0_7] : memref<8x1xf32, #tpu.memory_space<vmem>>, vector<8x1xf32>
    %c0_8 = arith.constant 0 : index
    %c0_9 = arith.constant 0 : index
    %7 = vector.load %arg9[%c0_8, %c0_9] : memref<8x1xf32, #tpu.memory_space<vmem>>, vector<8x1xf32>
    %c0_10 = arith.constant 0 : index
    %c0_11 = arith.constant 0 : index
    %8 = vector.load %arg7[%c0_10, %c0_11] : memref<8x1xf32, #tpu.memory_space<vmem>>, vector<8x1xf32>
    %c0_12 = arith.constant 0 : index
    %c0_13 = arith.constant 0 : index
    %9 = vector.load %arg8[%c0_12, %c0_13] : memref<8x1xf32, #tpu.memory_space<vmem>>, vector<8x1xf32>
    %c0_14 = arith.constant 0 : index
    %c0_15 = arith.constant 0 : index
    %10 = vector.load %arg10[%c0_14, %c0_15] : memref<8x1xf32, #tpu.memory_space<vmem>>, vector<8x1xf32>
    %c0_16 = arith.constant 0 : index
    %c0_17 = arith.constant 0 : index
    %11 = vector.load %arg11[%c0_16, %c0_17] : memref<8x1xf32, #tpu.memory_space<vmem>>, vector<8x1xf32>
    %c0_18 = arith.constant 0 : index
    %c0_19 = arith.constant 0 : index
    %12 = vector.load %arg12[%c0_18, %c0_19] : memref<8x1xf32, #tpu.memory_space<vmem>>, vector<8x1xf32>
    %cst = arith.constant 0.333333343 : f32
    %13 = vector.broadcast %cst : f32 to vector<8x32xf32>
    %14 = arith.mulf %4, %13 : vector<8x32xf32>
    %cst_20 = arith.constant dense<0xFF800000> : vector<8xf32>
    %15 = vector.multi_reduction <maximumf>, %3, %cst_20 [1] : vector<8x32xf32> to vector<8xf32>
    %16 = vector.shape_cast %15 : vector<8xf32> to vector<8x1xf32>
    %cst_21 = arith.constant dense<0xFF800000> : vector<8xf32>
    %17 = vector.multi_reduction <maximumf>, %14, %cst_21 [1] : vector<8x32xf32> to vector<8xf32>
    %18 = vector.shape_cast %17 : vector<8xf32> to vector<8x1xf32>
    %19 = arith.maximumf %6, %16 : vector<8x1xf32>
    %20 = arith.maximumf %7, %18 : vector<8x1xf32>
    %cst_22 = arith.constant 0.333333343 : f32
    %21 = vector.broadcast %cst_22 : f32 to vector<8x1xf32>
    %22 = arith.mulf %6, %21 : vector<8x1xf32>
    %cst_23 = arith.constant 0.333333343 : f32
    %23 = vector.broadcast %cst_23 : f32 to vector<8x1xf32>
    %24 = arith.mulf %19, %23 : vector<8x1xf32>
    %25 = arith.subf %6, %19 : vector<8x1xf32>
    %26 = math.exp %25 : vector<8x1xf32>
    %27 = arith.subf %22, %24 : vector<8x1xf32>
    %28 = math.exp %27 : vector<8x1xf32>
    %29 = arith.subf %7, %20 : vector<8x1xf32>
    %30 = math.exp %29 : vector<8x1xf32>
    %31 = vector.broadcast %19 : vector<8x1xf32> to vector<8x32xf32>
    %32 = arith.subf %3, %31 : vector<8x32xf32>
    %cst_24 = arith.constant 0.333333343 : f32
    %33 = vector.broadcast %cst_24 : f32 to vector<8x32xf32>
    %34 = arith.mulf %32, %33 : vector<8x32xf32>
    %35 = vector.broadcast %20 : vector<8x1xf32> to vector<8x32xf32>
    %36 = arith.subf %14, %35 : vector<8x32xf32>
    %37 = math.exp %32 : vector<8x32xf32>
    %38 = math.exp %34 : vector<8x32xf32>
    %39 = math.exp %36 : vector<8x32xf32>
    %cst_25 = arith.constant dense<0.000000e+00> : vector<8xf32>
    %40 = vector.multi_reduction <add>, %37, %cst_25 [1] : vector<8x32xf32> to vector<8xf32>
    %41 = vector.shape_cast %40 : vector<8xf32> to vector<8x1xf32>
    %cst_26 = arith.constant dense<0.000000e+00> : vector<8xf32>
    %42 = vector.multi_reduction <add>, %38, %cst_26 [1] : vector<8x32xf32> to vector<8xf32>
    %43 = vector.shape_cast %42 : vector<8xf32> to vector<8x1xf32>
    %cst_27 = arith.constant dense<0.000000e+00> : vector<8xf32>
    %44 = vector.multi_reduction <add>, %39, %cst_27 [1] : vector<8x32xf32> to vector<8xf32>
    %45 = vector.shape_cast %44 : vector<8xf32> to vector<8x1xf32>
    %46 = arith.subf %36, %34 : vector<8x32xf32>
    %47 = arith.mulf %39, %46 : vector<8x32xf32>
    %cst_28 = arith.constant dense<0.000000e+00> : vector<8xf32>
    %48 = vector.multi_reduction <add>, %47, %cst_28 [1] : vector<8x32xf32> to vector<8xf32>
    %49 = vector.shape_cast %48 : vector<8xf32> to vector<8x1xf32>
    %50 = tpu.iota {dimensions = array<i32: 1>} : vector<8x32xi32>
    %c32_i32 = arith.constant 32 : i32
    %51 = arith.muli %arg1, %c32_i32 : i32
    %52 = vector.broadcast %51 : i32 to vector<8x32xi32>
    %53 = arith.addi %50, %52 : vector<8x32xi32>
    %54 = vector.broadcast %5 : vector<8x1xi32> to vector<8x32xi32>
    %55 = arith.cmpi eq, %53, %54 : vector<8x32xi32>
    %56 = arith.extui %55 : vector<8x32xi1> to vector<8x32xi32>
    %57 = arith.sitofp %56 : vector<8x32xi32> to vector<8x32xf32>
    %58 = arith.mulf %57, %3 : vector<8x32xf32>
    %cst_29 = arith.constant dense<0.000000e+00> : vector<8xf32>
    %59 = vector.multi_reduction <add>, %58, %cst_29 [1] : vector<8x32xf32> to vector<8xf32>
    %60 = vector.shape_cast %59 : vector<8xf32> to vector<8x1xf32>
    %61 = arith.subf %7, %20 : vector<8x1xf32>
    %62 = arith.subf %24, %22 : vector<8x1xf32>
    %63 = arith.addf %61, %62 : vector<8x1xf32>
    %64 = arith.mulf %26, %8 : vector<8x1xf32>
    %65 = arith.addf %64, %41 : vector<8x1xf32>
    %66 = arith.mulf %28, %9 : vector<8x1xf32>
    %67 = arith.addf %66, %43 : vector<8x1xf32>
    %68 = arith.mulf %10, %63 : vector<8x1xf32>
    %69 = arith.addf %11, %68 : vector<8x1xf32>
    %70 = arith.mulf %30, %69 : vector<8x1xf32>
    %71 = arith.addf %70, %49 : vector<8x1xf32>
    %72 = arith.mulf %30, %10 : vector<8x1xf32>
    %73 = arith.addf %72, %45 : vector<8x1xf32>
    %74 = arith.addf %12, %60 : vector<8x1xf32>
    %c0_30 = arith.constant 0 : index
    %c0_31 = arith.constant 0 : index
    %75 = vector.load %arg6[%c0_30, %c0_31] : memref<8x1xf32, #tpu.memory_space<vmem>>, vector<8x1xf32>
    tpu.vector_store %arg6[%c0_30, %c0_31], %19 {strides = array<i32>} : memref<8x1xf32, #tpu.memory_space<vmem>>, vector<8x1xf32>,
    %c0_32 = arith.constant 0 : index
    %c0_33 = arith.constant 0 : index
    %76 = vector.load %arg9[%c0_32, %c0_33] : memref<8x1xf32, #tpu.memory_space<vmem>>, vector<8x1xf32>
    tpu.vector_store %arg9[%c0_32, %c0_33], %20 {strides = array<i32>} : memref<8x1xf32, #tpu.memory_space<vmem>>, vector<8x1xf32>,
    %c0_34 = arith.constant 0 : index
    %c0_35 = arith.constant 0 : index
    %77 = vector.load %arg7[%c0_34, %c0_35] : memref<8x1xf32, #tpu.memory_space<vmem>>, vector<8x1xf32>
    tpu.vector_store %arg7[%c0_34, %c0_35], %65 {strides = array<i32>} : memref<8x1xf32, #tpu.memory_space<vmem>>, vector<8x1xf32>,
    %c0_36 = arith.constant 0 : index
    %c0_37 = arith.constant 0 : index
    %78 = vector.load %arg8[%c0_36, %c0_37] : memref<8x1xf32, #tpu.memory_space<vmem>>, vector<8x1xf32>
    tpu.vector_store %arg8[%c0_36, %c0_37], %67 {strides = array<i32>} : memref<8x1xf32, #tpu.memory_space<vmem>>, vector<8x1xf32>,
    %c0_38 = arith.constant 0 : index
    %c0_39 = arith.constant 0 : index
    %79 = vector.load %arg10[%c0_38, %c0_39] : memref<8x1xf32, #tpu.memory_space<vmem>>, vector<8x1xf32>
    tpu.vector_store %arg10[%c0_38, %c0_39], %73 {strides = array<i32>} : memref<8x1xf32, #tpu.memory_space<vmem>>, vector<8x1xf32>,
    %c0_40 = arith.constant 0 : index
    %c0_41 = arith.constant 0 : index
    %80 = vector.load %arg11[%c0_40, %c0_41] : memref<8x1xf32, #tpu.memory_space<vmem>>, vector<8x1xf32>
    tpu.vector_store %arg11[%c0_40, %c0_41], %71 {strides = array<i32>} : memref<8x1xf32, #tpu.memory_space<vmem>>, vector<8x1xf32>,
    %c0_42 = arith.constant 0 : index
    %c0_43 = arith.constant 0 : index
    %81 = vector.load %arg12[%c0_42, %c0_43] : memref<8x1xf32, #tpu.memory_space<vmem>>, vector<8x1xf32>
    tpu.vector_store %arg12[%c0_42, %c0_43], %74 {strides = array<i32>} : memref<8x1xf32, #tpu.memory_space<vmem>>, vector<8x1xf32>,
    %c0_i32_44 = arith.constant 0 : i32
    %82 = arith.cmpi eq, %arg1, %c0_i32_44 : i32
    %83 = arith.extui %82 : i1 to i32
    %c0_i32_45 = arith.constant 0 : i32
    %84 = arith.cmpi ne, %83, %c0_i32_45 : i32
    scf.if %84 {
      %85 = math.log %65 : vector<8x1xf32>
      %86 = arith.addf %19, %85 : vector<8x1xf32>
      %87 = arith.subf %86, %74 : vector<8x1xf32>
      %88 = tpu.reciprocal %73 {approx = true} : vector<8x1xf32> -> vector<8x1xf32>
      %89 = arith.mulf %71, %88 : vector<8x1xf32>
      %90 = math.log %67 : vector<8x1xf32>
      %91 = arith.addf %89, %90 : vector<8x1xf32>
      %92 = math.log %73 : vector<8x1xf32>
      %93 = arith.subf %91, %92 : vector<8x1xf32>
      %94 = vector.shape_cast %87 : vector<8x1xf32> to vector<1x8x1xf32>
      %cst_46 = arith.constant dense<0.000000e+00> : vector<1xf32>
      %95 = vector.multi_reduction <add>, %94, %cst_46 [1, 2] : vector<1x8x1xf32> to vector<1xf32>
      %96 = vector.shape_cast %95 : vector<1xf32> to vector<1x1x1xf32>
      %97 = vector.extract %96[0, 0, 0] : f32 from vector<1x1x1xf32>
      %98 = vector.shape_cast %93 : vector<8x1xf32> to vector<1x8x1xf32>
      %cst_47 = arith.constant dense<0.000000e+00> : vector<1xf32>
      %99 = vector.multi_reduction <add>, %98, %cst_47 [1, 2] : vector<1x8x1xf32> to vector<1xf32>
      %100 = vector.shape_cast %99 : vector<1xf32> to vector<1x1x1xf32>
      %101 = vector.extract %100[0, 0, 0] : f32 from vector<1x1x1xf32>
      %102 = tpu.iota {dimensions = array<i32: 1>} : vector<1x8x128xi32>
      %c0_i32_48 = arith.constant 0 : i32
      %103 = vector.broadcast %c0_i32_48 : i32 to vector<1x8x128xi32>
      %104 = arith.cmpi eq, %102, %103 : vector<1x8x128xi32>
      %c1_i32 = arith.constant 1 : i32
      %105 = vector.broadcast %c1_i32 : i32 to vector<1x8x128xi32>
      %106 = arith.cmpi eq, %102, %105 : vector<1x8x128xi32>
      %cst_49 = arith.constant 0.000000e+00 : f32
      %107 = vector.broadcast %101 : f32 to vector<1x8x128xf32>
      %108 = vector.broadcast %cst_49 : f32 to vector<1x8x128xf32>
      %109 = arith.select %106, %107, %108 : vector<1x8x128xi1>, vector<1x8x128xf32>
      %110 = vector.broadcast %97 : f32 to vector<1x8x128xf32>
      %111 = arith.select %104, %110, %109 : vector<1x8x128xi1>, vector<1x8x128xf32>
      %c0_50 = arith.constant 0 : index
      %c0_51 = arith.constant 0 : index
      %c0_52 = arith.constant 0 : index
      %112 = vector.load %arg5[%c0_50, %c0_51, %c0_52] : memref<1x8x128xf32, #tpu.memory_space<vmem>>, vector<1x8x128xf32>
      tpu.vector_store %arg5[%c0_50, %c0_51, %c0_52], %111 {strides = array<i32>} : memref<1x8x128xf32, #tpu.memory_space<vmem>>, vector<1x8x128xf32>,
    } else {
    }
    return
  }
  func.func @transform_0(%arg0: i32, %arg1: i32) -> (i32, i32) {
    %c0_i32 = arith.constant 0 : i32
    return %arg0, %arg1 : i32, i32
  }
  func.func @transform_1(%arg0: i32, %arg1: i32) -> (i32, i32) {
    %c0_i32 = arith.constant 0 : i32
    return %arg0, %arg1 : i32, i32
  }
  func.func @transform_2(%arg0: i32, %arg1: i32) -> (i32, i32) {
    %c0_i32 = arith.constant 0 : i32
    %c0_i32_0 = arith.constant 0 : i32
    return %arg0, %c0_i32 : i32, i32
  }
  func.func @transform_3(%arg0: i32, %arg1: i32) -> (i32, i32, i32) {
    %c0_i32 = arith.constant 0 : i32
    %c0_i32_0 = arith.constant 0 : i32
    %c0_i32_1 = arith.constant 0 : i32
    return %arg0, %c0_i32, %c0_i32_0 : i32, i32, i32
  }
}

</mosaic_0001>

<bundles_post_ra>
// kernel: tpu_custom_call.1
= control target key start
LH: loop header
LB: loop body
LE: loop exit
PB: predicated region body
PF: predicated region fallthrough
CT: control target
= control target key end

     0   :  { %8 = vsyncpa [#allocation10], 0  ;;  %s361_s0 = inlined_call_operand.vmem [shape: f32[8,32], index: 0, kind: input, shape index: {}]   ;;  %s362_s1 = inlined_call_operand.hbm [shape: f32[8,32], index: 1, kind: input, shape index: {}]   ;;  %s363_s2 = inlined_call_operand.vmem [shape: s32[8,1], index: 2, kind: input, shape index: {}]   ;;  %s364_s3 = inlined_call_operand.hbm [shape: f32[1,8,128], index: 3, kind: output, shape index: {}]  }
   0x1   :  { %9 = vsyncpa [#allocation11], 0  ;;  %s17_s14 = sshll.u32 %s362_s1, 4  ;;  %s287_s15 = smov [#allocation9]   ;;  %s18_s14 = int_to_ptr.hbm [resolvable:$true] %s17_s14 }
   0x2   :  { %s19_s16 = sshll.u32 %s287_s15, 4  ;;  %s20_s16 = int_to_ptr.vmem [resolvable:$true] %s19_s16 }
   0x3   :  { %22 = dma.hbm_to_vmem [thread:$0]  %s18_s14, 128, %s20_s16, [#allocation10]  }
   0x4   :  { %283 = dma.done.wait [#allocation10], 128  }
   0x5   :  { %284 = vsyncadd [#allocation10], 4294967168  ;;  %vm33_vm0 = vcmask 7168   ;;  %v288_v0 = vmov -1e+30   ;;  %vm52_vm1 = vcmask 261120   ;;  %v105_v34 = vlaneseq }
   0x6   :  { %34 = vst.msk [vmem:[#allocation2] sm:$0xff] %vm33_vm0, %v288_v0  ;;  %v320_v1 = vld [vmem:[%s361_s0] sm:$0xff]  ;;  %v42_v2 = vld [vmem:[#allocation9] sm:$0xff]  ;;  %v289_v6 = vmov 0   ;;  %v290_v7 = vmov 0.0   ;;  %s192_s23 = sshll.u32 %s364_s3, 4  ;;  %s193_s23 = int_to_ptr.hbm [resolvable:$true] %s192_s23 }
   0x7   :  { %35 = vst.msk [vmem:[#allocation5] sm:$0xff] %vm33_vm0, %v288_v0  ;;  %v53_v3 = vsel %vm52_vm1, %v320_v1, -inf  ;;  %v51_v4 = vmul.f32 0.33333334, %v42_v2  ;;  %212 = vset.pattern.permute.xlu1 %v289_v6  ;;  %213 = vset.pattern.permute.xlu2 %v289_v6  ;;  %v43_v8 = vld [vmem:[%s363_s2] sm:$0xff]  ;;  %v106_v40 = vand.u32 127, %v105_v34 }
   0x8   :  { %54 = vmax.xlane.f32.xlu0 %v53_v3  ;;  %36 = vst.msk [vmem:[#allocation3] sm:$0xff] %vm33_vm0, %v290_v7  ;;  %111 = vperm.xlu2 %213, %v43_v8   ;;  %s291_s2 = smov [#allocation12]  }
   0x9   :  { %v56_v5 = vsel %vm52_vm1, %v51_v4, -inf  ;;  %214 = vset.pattern.permute.xlu0 %v289_v6  ;;  %37 = vst.msk [vmem:[#allocation4] sm:$0xff] %vm33_vm0, %v290_v7  ;;  %s190_s19 = sshll.u32 %s291_s2, 4  ;;  %s191_s19 = int_to_ptr.vmem [resolvable:$true] %s190_s19 }
   0xa   :  { %38 = vst.msk [vmem:[#allocation6] sm:$0xff] %vm33_vm0, %v290_v7 }
   0xb   :  { %39 = vst.msk [vmem:[#allocation7] sm:$0xff] %vm33_vm0, %v290_v7 }
   0xc   :  { %40 = vst.msk [vmem:[#allocation8] sm:$0xff] %vm33_vm0, %v290_v7 }
   0xd   :  { %v44_v9 = vld [vmem:[#allocation2] sm:$0xff] }
   0xe   :  { %v45_v12 = vld [vmem:[#allocation5] sm:$0xff]  ;;  %v61_v13 = vmul.f32 0.33333334, %v44_v9 }
   0xf   :  { %v46_v55 = vld [vmem:[#allocation3] sm:$0xff] }
  0x10   :  { %57 = vmax.xlane.f32.xlu0 %v56_v5  ;;  %v47_v57 = vld [vmem:[#allocation4] sm:$0xff] }
  0x11   :  { %v48_v21 = vld [vmem:[#allocation6] sm:$0xff] }
  0x12   :  { %v49_v23 = vld [vmem:[#allocation7] sm:$0xff] }
  0x13   :  { %v50_v8 = vld [vmem:[#allocation8] sm:$0xff] }
  0x62   :  { %v112_v41 = vpop.permute.xlu2 %111 }
  0x63   :  { %vm113_vm2 = vcmp.eq.s32.totalorder %v106_v40, %v112_v41 }
  0x64   :  { %v202_v46 = vsel %vm113_vm2, 1.0, %v290_v7 }
  0x65   :  { %v116_v48 = vmul.f32 %v202_v46, %v320_v1 }
  0x67   :  { %v117_v49 = vsel %vm52_vm1, %v116_v48, 0.0 }
  0x7b   :  { %v55_v10 = vpop.xlane.xlu0 %54 }
  0x7c   :  { %v333_v11 = vmax.f32 %v44_v9, %v55_v10 }
  0x7e   :  { %134 = vst.msk [vmem:[#allocation2] sm:$0xff] %vm33_vm0, %v333_v11  ;;  %74 = vperm.xlu1 %212, %v333_v11   ;;  %v62_v14 = vmul.f32 0.33333334, %v333_v11  ;;  %v63_v50 = vsub.f32 %v44_v9, %v333_v11 }
  0x80   :  { %v120_v18 = vsub.f32 %v62_v14, %v61_v13  ;;  %v66_v51 = vsub.f32 %v61_v13, %v62_v14  ;;  %v64_v52 = vmul.f32 1.442695, %v63_v50 }
  0x82   :  { %v67_v53 = vmul.f32 1.442695, %v66_v51 }
  0x83   :  { %v58_v15 = vpop.xlane.xlu0 %57 }
  0x84   :  { %v60_v16 = vmax.f32 %v45_v12, %v58_v15 }
  0x86   :  { %v69_v17 = vsub.f32 %v45_v12, %v60_v16  ;;  %135 = vst.msk [vmem:[#allocation5] sm:$0xff] %vm33_vm0, %v60_v16  ;;  %81 = vperm.xlu1 %212, %v60_v16  }
  0x88   :  { %v70_v19 = vmul.f32 1.442695, %v69_v17  ;;  %v121_v20 = vadd.f32 %v120_v18, %v69_v17 }
  0x8a   :  { %215 = vpow2.f32 %v70_v19  ;;  %v126_v22 = vmul.f32 %v121_v20, %v48_v21 }
  0x8c   :  { %v127_v24 = vadd.f32 %v126_v22, %v49_v23 }
  0x90   :  { %v216_v25 = vpop.eup %215 }
  0x91   :  { %v128_v26 = vmul.f32 %v216_v25, %v127_v24  ;;  %v130_v0 = vmul.f32 %v216_v25, %v48_v21 }
  0xf0   :  { %v75_v27 = vpop.permute.xlu1 %74 }
  0xf1   :  { %v77_v28 = vsub.f32 %v320_v1, %v75_v27 }
  0xf3   :  { %v78_v29 = vmul.f32 0.33333334, %v77_v28  ;;  %v85_v30 = vmul.f32 1.442695, %v77_v28 }
  0xf5   :  { %217 = vpow2.f32 %v85_v30  ;;  %v87_v31 = vmul.f32 1.442695, %v78_v29 }
  0xf7   :  { %219 = vpow2.f32 %v87_v31 }
  0xf8   :  { %v82_v32 = vpop.permute.xlu1 %81 }
  0xf9   :  { %v84_v33 = vsub.f32 %v51_v4, %v82_v32 }
  0xfb   :  { %v218_v35 = vpop.eup %217  ;;  %v89_v36 = vmul.f32 1.442695, %v84_v33  ;;  %v100_v42 = vsub.f32 %v84_v33, %v78_v29 }
  0xfc   :  { %v91_v37 = vsel %vm52_vm1, %v218_v35, 0.0 }
  0xfd   :  { %v220_v38 = vpop.eup %219  ;;  %221 = vpow2.f32 %v89_v36  ;;  %92 = vadd.xlane.f32.xlu2 %v91_v37  ;;  %v177_v37 = vshrl.u32 %v105_v34, 7 }
  0xfe   :  { %v94_v39 = vsel %vm52_vm1, %v220_v38, 0.0  ;;  %223 = vpow2.f32 %v64_v52 }
  0xff   :  { %95 = vadd.xlane.f32.xlu0 %v94_v39  ;;  %225 = vpow2.f32 %v67_v53  ;;  %vm179_vm3 = vcmp.eq.s32.totalorder %v177_v37, 1  ;;  %vm178_vm4 = vcmp.eq.s32.totalorder %v177_v37, 0 }
 0x103   :  { %v222_v43 = vpop.eup %221 }
 0x104   :  { %v97_v44 = vsel %vm52_vm1, %v222_v43, 0.0  ;;  %v101_v45 = vmul.f32 %v222_v43, %v100_v42  ;;  %v224_v54 = vpop.eup %223 }
 0x105   :  { %98 = vadd.xlane.f32.xlu1 %v97_v44  ;;  %v226_v56 = vpop.eup %225  ;;  %v122_v58 = vmul.f32 %v224_v54, %v46_v55 }
 0x106   :  { %v102_v47 = vsel %vm52_vm1, %v101_v45, 0.0  ;;  %v124_v61 = vmul.f32 %v226_v56, %v47_v57 }
 0x107   :  { %103 = vadd.xlane.f32.xlu0 %v102_v47 }
 0x10f   :  { %118 = vadd.xlane.f32.xlu0 %v117_v49 }
 0x170   :  { %v93_v59 = vpop.xlane.xlu2 %92 }
 0x171   :  { %v123_v60 = vadd.f32 %v122_v58, %v93_v59 }
 0x172   :  { %v96_v62 = vpop.xlane.xlu0 %95 }
 0x173   :  { %136 = vst.msk [vmem:[#allocation3] sm:$0xff] %vm33_vm0, %v123_v60  ;;  %v125_v63 = vadd.f32 %v124_v61, %v96_v62  ;;  %227 = vlog2.f32 %v123_v60 }
 0x175   :  { %137 = vst.msk [vmem:[#allocation4] sm:$0xff] %vm33_vm0, %v125_v63  ;;  %229 = vlog2.f32 %v125_v63 }
 0x178   :  { %v99_v1 = vpop.xlane.xlu1 %98 }
 0x179   :  { %v131_v2 = vadd.f32 %v130_v0, %v99_v1  ;;  %v228_v5 = vpop.eup %227 }
 0x17a   :  { %v104_v3 = vpop.xlane.xlu0 %103  ;;  %v145_v7 = vmul.f32 0.6931472, %v228_v5 }
 0x17b   :  { %138 = vst.msk [vmem:[#allocation6] sm:$0xff] %vm33_vm0, %v131_v2  ;;  %231 = vrcp.f32 %v131_v2  ;;  %v129_v4 = vadd.f32 %v128_v26, %v104_v3  ;;  %v230_v6 = vpop.eup %229 }
 0x17c   :  { %233 = vlog2.f32 %v131_v2  ;;  %v151_v12 = vmul.f32 0.6931472, %v230_v6  ;;  %v146_v16 = vadd.f32 %v145_v7, %v333_v11 }
 0x17d   :  { %139 = vst.msk [vmem:[#allocation7] sm:$0xff] %vm33_vm0, %v129_v4 }
 0x181   :  { %v232_v9 = vpop.eup %231 }
 0x182   :  { %v234_v10 = vpop.eup %233  ;;  %v149_v13 = vmul.f32 %v232_v9, %v129_v4  ;;  %v119_v14 = vpop.xlane.xlu0 %118 }
 0x183   :  { %v132_v15 = vadd.f32 %v119_v14, %v50_v8  ;;  %v154_v18 = vmul.f32 0.6931472, %v234_v10 }
 0x184   :  { %v152_v17 = vadd.f32 %v151_v12, %v149_v13 }
 0x185   :  { %140 = vst.msk [vmem:[#allocation8] sm:$0xff] %vm33_vm0, %v132_v15  ;;  %v147_v19 = vsub.f32 %v146_v16, %v132_v15 }
 0x186   :  { %v155_v20 = vsub.f32 %v152_v17, %v154_v18 }
 0x187   :  { %v156_v21 = vsel %vm33_vm0, %v147_v19, 0.0 }
 0x188   :  { %157 = vadd.xlane.f32.xlu0 %v156_v21  ;;  %v166_v22 = vsel %vm33_vm0, %v155_v20, 0.0 }
 0x190   :  { %167 = vadd.xlane.f32.xlu0 %v166_v22 }
 0x1fb   :  { %v158_v23 = vpop.xlane.xlu0 %157 }
 0x1fc   :  { %v159_v24 = vrot.slane %v158_v23, 4 }
 0x1fe   :  { %v160_v25 = vadd.f32 %v159_v24, %v158_v23 }
 0x200   :  { %v161_v26 = vrot.slane %v160_v25, 2 }
 0x202   :  { %v162_v27 = vadd.f32 %v161_v26, %v160_v25 }
 0x203   :  { %v168_v28 = vpop.xlane.xlu0 %167 }
 0x204   :  { %v169_v29 = vrot.slane %v168_v28, 4  ;;  %v163_v11 = vrot.slane %v162_v27, 1 }
 0x206   :  { %v170_v30 = vadd.f32 %v169_v29, %v168_v28  ;;  %v164_v31 = vadd.f32 %v163_v11, %v162_v27 }
 0x208   :  { %v171_v32 = vrot.slane %v170_v30, 2  ;;  %203 = vpush %v164_v31 }
 0x20a   :  { %v172_v33 = vadd.f32 %v171_v32, %v170_v30 }
 0x20c   :  { %v173_v35 = vrot.slane %v172_v33, 1 }
 0x20e   :  { %v174_v36 = vadd.f32 %v173_v35, %v172_v33 }
 0x210   :  { %205 = vpush %v174_v36 }
 0x239   :  { %s204_s20 = spop %203 }
 0x23a   :  { %v182_v39 = vstv %s204_s20 }
 0x241   :  { %s206_s24 = spop %205 }
 0x242   :  { %v180_v38 = vstv %s206_s24 }
 0x243   :  { %v181_v40 = vsel %vm179_vm3, %v180_v38, 0.0 }
 0x244   :  { %v183_v41 = vsel %vm178_vm4, %v182_v39, %v181_v40 }
 0x245   :  { %184 = vst [vmem:[#allocation12] sm:$0xff] %v183_v41 }
 0x246   :  { %195 = dma.vmem_to_hbm [thread:$0]  %s191_s19, 128, %s193_s23, [#allocation11]  }
 0x247   :  { %285 = dma.done.wait [#allocation11], 128  }
 0x248   :  { %286 = vsyncadd [#allocation11], 4294967168 }
 0x249   :  { %200 = vsyncpa [#allocation10], 1 }
 0x24a   :  { %201 = vsyncpa [#allocation11], 1 }

</bundles_post_ra>
